<compile_context>
chip_gen: v7x
topology: tpu7x:2x2x1
jax: 0.10.0
libtpu: 0.0.40
codegen_flags: <defaults>
</compile_context>

<pallas_src>
import functools

import jax
import jax.numpy as jnp
from jax.experimental import pallas as pl
from jax.experimental.pallas import tpu as pltpu


def _make_sbp_kernel(steps, cin):
    """Build the fused SBP kernel for a fixed (static) step count / channel count."""

    def kernel(w_ref, x_ref, out_ref):
        # w_ref   : SMEM (cin + 2,)        = [wx[0..cin-1, 0], ws, b] (scalar weights)
        # x_ref   : VMEM (cin, R, L)       channels-first pixel tile (f32)
        # out_ref : VMEM (3*steps, R, L)   rows [0:steps)        = a_logits per step
        #                                  rows [steps:2*steps)  = log_m per step
        #                                  rows [2*steps:3*steps) = log_s_{k+1} per step
        # Step-invariant pre-activation: bias + sum_c wx[c,0] * x[c]  (pure VPU FMAs).
        pre = w_ref[cin + 1] + w_ref[0] * x_ref[0]
        for c in range(1, cin):
            pre = pre + w_ref[c] * x_ref[c]

        # Hoist the ws scalar->vreg broadcast out of the unrolled step loop
        # (JAX does not CSE broadcast_in_dim).
        ws_vec = jnp.full(pre.shape, w_ref[cin], dtype=jnp.float32)

        log_s = jnp.zeros(pre.shape, jnp.float32)  # log_s_0 = 0
        for k in range(steps):
            a_logits = pre + ws_vec * log_s
            # stable logsigmoid(z) = min(z, 0) - log1p(exp(-|z|))
            log_a = jnp.minimum(a_logits, 0.0) - jnp.log1p(jnp.exp(-jnp.abs(a_logits)))
            # store per step (static indices) -> dense (R, L) stores, no concatenates
            out_ref[k] = a_logits
            out_ref[steps + k] = log_s + log_a
            log_s = log_s + (log_a - a_logits)    # logsigmoid(-z) == logsigmoid(z) - z
            out_ref[2 * steps + k] = log_s

    return kernel


@functools.partial(jax.jit, static_argnames=("steps", "rows_per_tile", "lane",
                                              "vmem_limit"))
def sbp_fused_steps(x3, w_packed, *, steps, rows_per_tile, lane, vmem_limit):
    """Run all SBP steps in one pallas_call.

    x3:       (Cin, rows_padded, L) float32 channels-first pixel slabs.
    w_packed: (Cin + 2,) float32 = [wx[:, 0], ws, b] (only core channel 0 is used).
    Returns a fused slab (3*steps, rows_padded, L) float32:
      [0:steps) a_logits, [steps:2*steps) log_m, [2*steps:3*steps) log_s.
    """
    cin, rows_padded, L = x3.shape
    assert L == lane and rows_padded % rows_per_tile == 0
    grid = rows_padded // rows_per_tile

    kernel = _make_sbp_kernel(steps, cin)
    out_sds = jax.ShapeDtypeStruct((3 * steps, rows_padded, L), jnp.float32)

    return pl.pallas_call(
        kernel,
        out_shape=out_sds,
        grid_spec=pltpu.PrefetchScalarGridSpec(
            num_scalar_prefetch=0,
            grid=(grid,),
            in_specs=[
                # scalar weights live in SMEM (whole array, untiled)
                pl.BlockSpec(memory_space=pltpu.MemorySpace.SMEM),
                # channels-first pixel tile: (cin, R, L), pixels dense on sublane x lane
                pl.BlockSpec((cin, rows_per_tile, L), lambda i: (0, i, 0)),
            ],
            # single fused output slab -> one writeback pipeline per grid step
            out_specs=pl.BlockSpec((3 * steps, rows_per_tile, L),
                                   lambda i: (0, i, 0)),
        ),
        compiler_params=pltpu.CompilerParams(
            dimension_semantics=("parallel",),   # pixel tiles shard across TCs (v7x)
            vmem_limit_bytes=vmem_limit),
    )(w_packed, x3)


def _choose_tiling(n, cin, steps, vmem_tile_budget=20 << 20):
    """Pick (L, R, rows_padded, grid): lane width, rows per tile, padded row count."""
    # Lane-slab width: up to 1024 lanes, multiple of 128.
    if n >= 1024:
        lane = 1024
    else:
        lane = max(128, -(-n // 128) * 128)
    rows = -(-n // lane)                               # ceil(n / lane)
    # Double-buffered f32 bytes per pixel (input channels + 3*steps output rows).
    bytes_per_pixel = 2 * 4 * (cin + 3 * steps)
    max_pixels = max(8 * lane, vmem_tile_budget // bytes_per_pixel)
    max_rows = max(8, (max_pixels // lane) // 8 * 8)
    rows_per_tile = min(max_rows, -(-rows // 8) * 8, 512)   # multiple of 8
    grid = -(-rows // rows_per_tile)
    rows_padded = grid * rows_per_tile
    return lane, rows_per_tile, rows_padded, grid


def init_core_params(key, cin, cout):
    """Deterministic synthetic core: 1x1 conv over (cin + 1) input channels."""
    k1, k2, k3 = jax.random.split(key, 3)
    scale = 1.0 / jnp.sqrt(cin + 1.0)
    wx = jax.random.normal(k1, (cin, cout), jnp.float32) * scale
    ws = jax.random.normal(k2, (1, cout), jnp.float32) * scale
    b = jax.random.normal(k3, (1, cout), jnp.float32) * 0.1
    return wx, ws, b


def simple_sbp_forward(x_nchw, params, steps_to_run):
    """Mirrors SimpleSBP.forward.

    x_nchw: (B, C, H, W) float32.
    Returns (log_m_k, log_s_k, stats):
      log_m_k : list of steps_to_run + 1 arrays of shape (B, 1, H, W)
      log_s_k : list of steps_to_run + 1 arrays of shape (B, 1, H, W)
      stats   : dict with 'a_logits_k' -> list of (B, 1, H, W) arrays
    """
    wx, ws, b = params
    bsz, cin, h, w = x_nchw.shape
    n = bsz * h * w

    log_s0 = jnp.zeros((bsz, 1, h, w), jnp.float32)
    if steps_to_run == 0:
        return [log_s0], [log_s0], {"a_logits_k": []}

    # NCHW -> channels-first flat (Cin, N); pixels are the fast axis.
    x_cf = jnp.transpose(x_nchw, (1, 0, 2, 3)).reshape(cin, n).astype(jnp.float32)

    # Only channel 0 of the synthetic core is ever consumed (a_logits).
    w_packed = jnp.concatenate([wx[:, 0], ws[:, 0], b[:, 0]]).astype(jnp.float32)

    lane, rows_per_tile, rows_padded, _grid = _choose_tiling(n, cin, steps_to_run)
    n_padded = rows_padded * lane
    if n_padded > n:
        x_cf = jnp.pad(x_cf, ((0, 0), (0, n_padded - n)))
    x3 = x_cf.reshape(cin, rows_padded, lane)

    # Safe on every generation (<= 64 MiB physical per TC on v7x), well above the
    # ~20 MiB double-buffered tile working set.
    vmem_limit = 48 << 20

    slab = sbp_fused_steps(x3, w_packed, steps=steps_to_run,
                           rows_per_tile=rows_per_tile, lane=lane,
                           vmem_limit=vmem_limit)

    flat = slab.reshape(3 * steps_to_run, n_padded)[:, :n]

    def unstack(rows):  # (steps, N) -> list of (B, 1, H, W)
        r = rows.reshape(steps_to_run, bsz, 1, h, w)
        return [r[k] for k in range(steps_to_run)]

    a_list = unstack(flat[:steps_to_run])
    logm_list = unstack(flat[steps_to_run:2 * steps_to_run])
    logs_list = unstack(flat[2 * steps_to_run:])

    log_s_k = [log_s0] + logs_list
    log_m_k = logm_list + [log_s_k[-1]]
    stats = {"a_logits_k": a_list}
    return log_m_k, log_s_k, stats


def reference_forward(x_nchw, params, steps_to_run):
    """Pure-JAX reference of the same computation (sanity check)."""
    wx, ws, b = params
    bsz, cin, h, w = x_nchw.shape
    wx0 = wx[:, 0]
    log_s = jnp.zeros((bsz, 1, h, w), jnp.float32)
    log_m_k, log_s_k, a_k = [], [log_s], []
    for _ in range(steps_to_run):
        a = (jnp.einsum('bchw,c->bhw', x_nchw, wx0)[:, None]
             + ws[0, 0] * log_s + b[0, 0])
        log_a = jax.nn.log_sigmoid(a)
        log_neg_a = jax.nn.log_sigmoid(-a)
        a_k.append(a)
        log_m_k.append(log_s + log_a)
        log_s = log_s + log_neg_a
        log_s_k.append(log_s)
    log_m_k.append(log_s)
    return log_m_k, log_s_k, a_k


if __name__ == "__main__":
    key = jax.random.PRNGKey(0)
    k_x, k_p = jax.random.split(key)

    B, C, H, W = 2, 4, 16, 16
    COUT = 8
    STEPS = 3

    x = jax.random.normal(k_x, (B, C, H, W), jnp.float32)
    params = init_core_params(k_p, C, COUT)

    log_m_k, log_s_k, stats = simple_sbp_forward(x, params, STEPS)
    jax.block_until_ready(log_m_k[-1])

    # sanity check against the pure-JAX reference
    ref_m, ref_s, ref_a = reference_forward(x, params, STEPS)
    assert len(log_m_k) == STEPS + 1 and len(log_s_k) == STEPS + 1
    assert len(stats["a_logits_k"]) == STEPS
    for got, want in zip(log_m_k, ref_m):
        assert got.shape == want.shape
        assert jnp.allclose(got, want, atol=1e-5, rtol=1e-5), "log_m mismatch"
    for got, want in zip(log_s_k, ref_s):
        assert jnp.allclose(got, want, atol=1e-5, rtol=1e-5), "log_s mismatch"
    for got, want in zip(stats["a_logits_k"], ref_a):
        assert jnp.allclose(got, want, atol=1e-5, rtol=1e-5), "a_logits mismatch"

    print("KERNEL_OK")
</pallas_src>

<mosaic_0001>
module attributes {stable_mosaic.version = 11 : i64} {
  func.func @kernel(%arg0: i32, %arg1: memref<6xf32, #tpu.memory_space<smem>>, %arg2: memref<4x8x512xf32, #tpu.memory_space<vmem>>, %arg3: memref<9x8x512xf32, #tpu.memory_space<vmem>>) attributes {dimension_semantics = [#tpu.dimension_semantics<parallel>], iteration_bounds = array<i64: 1>, scalar_prefetch = 0 : i64, scratch_operands = 0 : i64, tpu.core_type = #tpu.core_type<tc>, window_params = [{transform_indices = @transform_0, window_bounds = array<i64: 6>}, {transform_indices = @transform_1, window_bounds = array<i64: 4, 8, 512>}, {transform_indices = @transform_2, window_bounds = array<i64: 9, 8, 512>}]} {
    %c5 = arith.constant 5 : index
    %0 = memref.load %arg1[%c5] : memref<6xf32, #tpu.memory_space<smem>>
    %c0 = arith.constant 0 : index
    %1 = memref.load %arg1[%c0] : memref<6xf32, #tpu.memory_space<smem>>
    %c0_0 = arith.constant 0 : index
    %c0_1 = arith.constant 0 : index
    %c0_2 = arith.constant 0 : index
    %2 = vector.load %arg2[%c0_0, %c0_1, %c0_2] : memref<4x8x512xf32, #tpu.memory_space<vmem>>, vector<1x8x512xf32>
    %3 = vector.shape_cast %2 : vector<1x8x512xf32> to vector<8x512xf32>
    %4 = vector.broadcast %1 : f32 to vector<8x512xf32>
    %5 = arith.mulf %4, %3 : vector<8x512xf32>
    %6 = vector.broadcast %0 : f32 to vector<8x512xf32>
    %7 = arith.addf %6, %5 : vector<8x512xf32>
    %c1 = arith.constant 1 : index
    %8 = memref.load %arg1[%c1] : memref<6xf32, #tpu.memory_space<smem>>
    %c1_3 = arith.constant 1 : index
    %c0_4 = arith.constant 0 : index
    %c0_5 = arith.constant 0 : index
    %9 = vector.load %arg2[%c1_3, %c0_4, %c0_5] : memref<4x8x512xf32, #tpu.memory_space<vmem>>, vector<1x8x512xf32>
    %10 = vector.shape_cast %9 : vector<1x8x512xf32> to vector<8x512xf32>
    %11 = vector.broadcast %8 : f32 to vector<8x512xf32>
    %12 = arith.mulf %11, %10 : vector<8x512xf32>
    %13 = arith.addf %7, %12 : vector<8x512xf32>
    %c2 = arith.constant 2 : index
    %14 = memref.load %arg1[%c2] : memref<6xf32, #tpu.memory_space<smem>>
    %c2_6 = arith.constant 2 : index
    %c0_7 = arith.constant 0 : index
    %c0_8 = arith.constant 0 : index
    %15 = vector.load %arg2[%c2_6, %c0_7, %c0_8] : memref<4x8x512xf32, #tpu.memory_space<vmem>>, vector<1x8x512xf32>
    %16 = vector.shape_cast %15 : vector<1x8x512xf32> to vector<8x512xf32>
    %17 = vector.broadcast %14 : f32 to vector<8x512xf32>
    %18 = arith.mulf %17, %16 : vector<8x512xf32>
    %19 = arith.addf %13, %18 : vector<8x512xf32>
    %c3 = arith.constant 3 : index
    %20 = memref.load %arg1[%c3] : memref<6xf32, #tpu.memory_space<smem>>
    %c3_9 = arith.constant 3 : index
    %c0_10 = arith.constant 0 : index
    %c0_11 = arith.constant 0 : index
    %21 = vector.load %arg2[%c3_9, %c0_10, %c0_11] : memref<4x8x512xf32, #tpu.memory_space<vmem>>, vector<1x8x512xf32>
    %22 = vector.shape_cast %21 : vector<1x8x512xf32> to vector<8x512xf32>
    %23 = vector.broadcast %20 : f32 to vector<8x512xf32>
    %24 = arith.mulf %23, %22 : vector<8x512xf32>
    %25 = arith.addf %19, %24 : vector<8x512xf32>
    %c4 = arith.constant 4 : index
    %26 = memref.load %arg1[%c4] : memref<6xf32, #tpu.memory_space<smem>>
    %27 = vector.broadcast %26 : f32 to vector<8x512xf32>
    %cst = arith.constant 0.000000e+00 : f32
    %28 = vector.broadcast %cst : f32 to vector<8x512xf32>
    %29 = arith.mulf %27, %28 : vector<8x512xf32>
    %30 = arith.addf %25, %29 : vector<8x512xf32>
    %cst_12 = arith.constant 0.000000e+00 : f32
    %31 = vector.broadcast %cst_12 : f32 to vector<8x512xf32>
    %32 = arith.minimumf %30, %31 : vector<8x512xf32>
    %33 = math.absf %30 : vector<8x512xf32>
    %cst_13 = arith.constant 0.000000e+00 : f32
    %34 = vector.broadcast %cst_13 : f32 to vector<8x512xf32>
    %35 = arith.subf %34, %33 : vector<8x512xf32>
    %36 = math.exp %35 : vector<8x512xf32>
    %37 = math.log1p %36 : vector<8x512xf32>
    %38 = arith.subf %32, %37 : vector<8x512xf32>
    %c0_14 = arith.constant 0 : index
    %c0_15 = arith.constant 0 : index
    %c0_16 = arith.constant 0 : index
    %39 = vector.load %arg3[%c0_14, %c0_15, %c0_16] : memref<9x8x512xf32, #tpu.memory_space<vmem>>, vector<1x8x512xf32>
    %40 = vector.shape_cast %39 : vector<1x8x512xf32> to vector<8x512xf32>
    %41 = vector.shape_cast %30 : vector<8x512xf32> to vector<1x8x512xf32>
    tpu.vector_store %arg3[%c0_14, %c0_15, %c0_16], %41 {strides = array<i32>} : memref<9x8x512xf32, #tpu.memory_space<vmem>>, vector<1x8x512xf32>,
    %42 = arith.addf %28, %38 : vector<8x512xf32>
    %c3_17 = arith.constant 3 : index
    %c0_18 = arith.constant 0 : index
    %c0_19 = arith.constant 0 : index
    %43 = vector.load %arg3[%c3_17, %c0_18, %c0_19] : memref<9x8x512xf32, #tpu.memory_space<vmem>>, vector<1x8x512xf32>
    %44 = vector.shape_cast %43 : vector<1x8x512xf32> to vector<8x512xf32>
    %45 = vector.shape_cast %42 : vector<8x512xf32> to vector<1x8x512xf32>
    tpu.vector_store %arg3[%c3_17, %c0_18, %c0_19], %45 {strides = array<i32>} : memref<9x8x512xf32, #tpu.memory_space<vmem>>, vector<1x8x512xf32>,
    %46 = arith.subf %38, %30 : vector<8x512xf32>
    %47 = arith.addf %28, %46 : vector<8x512xf32>
    %c6 = arith.constant 6 : index
    %c0_20 = arith.constant 0 : index
    %c0_21 = arith.constant 0 : index
    %48 = vector.load %arg3[%c6, %c0_20, %c0_21] : memref<9x8x512xf32, #tpu.memory_space<vmem>>, vector<1x8x512xf32>
    %49 = vector.shape_cast %48 : vector<1x8x512xf32> to vector<8x512xf32>
    %50 = vector.shape_cast %47 : vector<8x512xf32> to vector<1x8x512xf32>
    tpu.vector_store %arg3[%c6, %c0_20, %c0_21], %50 {strides = array<i32>} : memref<9x8x512xf32, #tpu.memory_space<vmem>>, vector<1x8x512xf32>,
    %51 = arith.mulf %27, %47 : vector<8x512xf32>
    %52 = arith.addf %25, %51 : vector<8x512xf32>
    %cst_22 = arith.constant 0.000000e+00 : f32
    %53 = vector.broadcast %cst_22 : f32 to vector<8x512xf32>
    %54 = arith.minimumf %52, %53 : vector<8x512xf32>
    %55 = math.absf %52 : vector<8x512xf32>
    %cst_23 = arith.constant 0.000000e+00 : f32
    %56 = vector.broadcast %cst_23 : f32 to vector<8x512xf32>
    %57 = arith.subf %56, %55 : vector<8x512xf32>
    %58 = math.exp %57 : vector<8x512xf32>
    %59 = math.log1p %58 : vector<8x512xf32>
    %60 = arith.subf %54, %59 : vector<8x512xf32>
    %c1_24 = arith.constant 1 : index
    %c0_25 = arith.constant 0 : index
    %c0_26 = arith.constant 0 : index
    %61 = vector.load %arg3[%c1_24, %c0_25, %c0_26] : memref<9x8x512xf32, #tpu.memory_space<vmem>>, vector<1x8x512xf32>
    %62 = vector.shape_cast %61 : vector<1x8x512xf32> to vector<8x512xf32>
    %63 = vector.shape_cast %52 : vector<8x512xf32> to vector<1x8x512xf32>
    tpu.vector_store %arg3[%c1_24, %c0_25, %c0_26], %63 {strides = array<i32>} : memref<9x8x512xf32, #tpu.memory_space<vmem>>, vector<1x8x512xf32>,
    %64 = arith.addf %47, %60 : vector<8x512xf32>
    %c4_27 = arith.constant 4 : index
    %c0_28 = arith.constant 0 : index
    %c0_29 = arith.constant 0 : index
    %65 = vector.load %arg3[%c4_27, %c0_28, %c0_29] : memref<9x8x512xf32, #tpu.memory_space<vmem>>, vector<1x8x512xf32>
    %66 = vector.shape_cast %65 : vector<1x8x512xf32> to vector<8x512xf32>
    %67 = vector.shape_cast %64 : vector<8x512xf32> to vector<1x8x512xf32>
    tpu.vector_store %arg3[%c4_27, %c0_28, %c0_29], %67 {strides = array<i32>} : memref<9x8x512xf32, #tpu.memory_space<vmem>>, vector<1x8x512xf32>,
    %68 = arith.subf %60, %52 : vector<8x512xf32>
    %69 = arith.addf %47, %68 : vector<8x512xf32>
    %c7 = arith.constant 7 : index
    %c0_30 = arith.constant 0 : index
    %c0_31 = arith.constant 0 : index
    %70 = vector.load %arg3[%c7, %c0_30, %c0_31] : memref<9x8x512xf32, #tpu.memory_space<vmem>>, vector<1x8x512xf32>
    %71 = vector.shape_cast %70 : vector<1x8x512xf32> to vector<8x512xf32>
    %72 = vector.shape_cast %69 : vector<8x512xf32> to vector<1x8x512xf32>
    tpu.vector_store %arg3[%c7, %c0_30, %c0_31], %72 {strides = array<i32>} : memref<9x8x512xf32, #tpu.memory_space<vmem>>, vector<1x8x512xf32>,
    %73 = arith.mulf %27, %69 : vector<8x512xf32>
    %74 = arith.addf %25, %73 : vector<8x512xf32>
    %cst_32 = arith.constant 0.000000e+00 : f32
    %75 = vector.broadcast %cst_32 : f32 to vector<8x512xf32>
    %76 = arith.minimumf %74, %75 : vector<8x512xf32>
    %77 = math.absf %74 : vector<8x512xf32>
    %cst_33 = arith.constant 0.000000e+00 : f32
    %78 = vector.broadcast %cst_33 : f32 to vector<8x512xf32>
    %79 = arith.subf %78, %77 : vector<8x512xf32>
    %80 = math.exp %79 : vector<8x512xf32>
    %81 = math.log1p %80 : vector<8x512xf32>
    %82 = arith.subf %76, %81 : vector<8x512xf32>
    %c2_34 = arith.constant 2 : index
    %c0_35 = arith.constant 0 : index
    %c0_36 = arith.constant 0 : index
    %83 = vector.load %arg3[%c2_34, %c0_35, %c0_36] : memref<9x8x512xf32, #tpu.memory_space<vmem>>, vector<1x8x512xf32>
    %84 = vector.shape_cast %83 : vector<1x8x512xf32> to vector<8x512xf32>
    %85 = vector.shape_cast %74 : vector<8x512xf32> to vector<1x8x512xf32>
    tpu.vector_store %arg3[%c2_34, %c0_35, %c0_36], %85 {strides = array<i32>} : memref<9x8x512xf32, #tpu.memory_space<vmem>>, vector<1x8x512xf32>,
    %86 = arith.addf %69, %82 : vector<8x512xf32>
    %c5_37 = arith.constant 5 : index
    %c0_38 = arith.constant 0 : index
    %c0_39 = arith.constant 0 : index
    %87 = vector.load %arg3[%c5_37, %c0_38, %c0_39] : memref<9x8x512xf32, #tpu.memory_space<vmem>>, vector<1x8x512xf32>
    %88 = vector.shape_cast %87 : vector<1x8x512xf32> to vector<8x512xf32>
    %89 = vector.shape_cast %86 : vector<8x512xf32> to vector<1x8x512xf32>
    tpu.vector_store %arg3[%c5_37, %c0_38, %c0_39], %89 {strides = array<i32>} : memref<9x8x512xf32, #tpu.memory_space<vmem>>, vector<1x8x512xf32>,
    %90 = arith.subf %82, %74 : vector<8x512xf32>
    %91 = arith.addf %69, %90 : vector<8x512xf32>
    %c8 = arith.constant 8 : index
    %c0_40 = arith.constant 0 : index
    %c0_41 = arith.constant 0 : index
    %92 = vector.load %arg3[%c8, %c0_40, %c0_41] : memref<9x8x512xf32, #tpu.memory_space<vmem>>, vector<1x8x512xf32>
    %93 = vector.shape_cast %92 : vector<1x8x512xf32> to vector<8x512xf32>
    %94 = vector.shape_cast %91 : vector<8x512xf32> to vector<1x8x512xf32>
    tpu.vector_store %arg3[%c8, %c0_40, %c0_41], %94 {strides = array<i32>} : memref<9x8x512xf32, #tpu.memory_space<vmem>>, vector<1x8x512xf32>,
    return
  }
  func.func @transform_0(%arg0: i32) -> i32 {
    %c0_i32 = arith.constant 0 : i32
    %c0_i32_0 = arith.constant 0 : i32
    return %c0_i32 : i32
  }
  func.func @transform_1(%arg0: i32) -> (i32, i32, i32) {
    %c0_i32 = arith.constant 0 : i32
    %c0_i32_0 = arith.constant 0 : i32
    %c0_i32_1 = arith.constant 0 : i32
    return %c0_i32, %arg0, %c0_i32_0 : i32, i32, i32
  }
  func.func @transform_2(%arg0: i32) -> (i32, i32, i32) {
    %c0_i32 = arith.constant 0 : i32
    %c0_i32_0 = arith.constant 0 : i32
    %c0_i32_1 = arith.constant 0 : i32
    return %c0_i32, %arg0, %c0_i32_0 : i32, i32, i32
  }
}

</mosaic_0001>

<bundles_post_ra>
// kernel: sbp_fused_steps.1
= control target key start
LH: loop header
LB: loop body
LE: loop exit
PB: predicated region body
PF: predicated region fallthrough
CT: control target
= control target key end

     0   :  { %7 = vsyncpa [#allocation5], 0  ;;  %s725_s0 = inlined_call_operand.vmem [shape: f32[6], index: 0, kind: input, shape index: {}]   ;;  %s726_s1 = inlined_call_operand.hbm [shape: f32[4,8,512], index: 1, kind: input, shape index: {}]   ;;  %s727_s2 = inlined_call_operand.hbm [shape: f32[9,8,512], index: 2, kind: output, shape index: {}]  }
   0x1   :  { %8 = vsyncpa [#allocation3], 0 }
   0x2   :  { %9 = vsyncpa [#allocation4], 0  ;;  %s16_s11 = sshll.u32 %s725_s0, 4  ;;  %s17_s11 = int_to_ptr.vmem [resolvable:$true] %s16_s11 }
   0x3   :  { %s459_s12 = scalar_lea.vmem %s17_s11, 16  ;;  %p464_p1 = scmp.lt.s32.totalorder %s17_s11, %s17_s11 }
   0x4   :  { %p460_p0 = scmp.ne.s32.totalorder %s17_s11, %s459_s12  ;;  %p465_p2 = scmp.lt.s32.totalorder %s459_s12, %s459_s12 }
   0x6   :  { %p466_p3 = por %p465_p2, %p464_p1 }
   0x8   :  { %p467_p4 = pnand %p466_p3, %p460_p0 }
   0xa   :  { %470 = shalt.err (!%p467_p4)
}
   0xb   :  { %s521_s13 = smov [#allocation2]   ;;  %s522_s14 = smov [#allocation6]  }
   0xc   :  { %19 = dma.vmem_to_smem %s17_s11, 16, %s521_s13, [#allocation5]  }
   0xd   :  { %s25_s15 = sshll.u32 %s522_s14, 4  ;;  %s471_s18 = scalar_lea.hbm %s726_s1, 2048  ;;  %s26_s15 = int_to_ptr.vmem [resolvable:$true] %s25_s15 }
   0xe   :  { %p472_p5 = scmp.ne.s32.totalorder %s726_s1, %s471_s18  ;;  %p475_p6 = scmp.lt.u32.totalorder %s471_s18, %s726_s1 }
  0x10   :  { %p477_p7 = pnand %p475_p6, %p472_p5 }
  0x12   :  { %480 = shalt.err (!%p477_p7)
}
  0x13   :  { %s481_s22 = scalar_lea.vmem %s26_s15, 2048  ;;  %p486_p9 = scmp.lt.s32.totalorder %s26_s15, %s26_s15 }
  0x14   :  { %p482_p8 = scmp.ne.s32.totalorder %s26_s15, %s481_s22  ;;  %p487_p10 = scmp.lt.s32.totalorder %s481_s22, %s481_s22 }
  0x16   :  { %p488_p11 = por %p487_p10, %p486_p9 }
  0x18   :  { %p489_p12 = pnand %p488_p11, %p482_p8 }
  0x1a   :  { %492 = shalt.err (!%p489_p12)
}
  0x1b   :  { %s523_s23 = smov 512   ;;  %s524_s24 = smov 32  }
  0x1c   :  { %31 = dma.hbm_to_vmem [thread:$0]  %s726_s1, 2048, %s26_s15, [#allocation3], %s523_s23, %s523_s23, %s524_s24  }
  0x1d   :  { %515 = dma.done.wait [#allocation5], 16  }
  0x1e   :  { %516 = vsyncadd [#allocation5], 4294967280 }
  0x1f   :  { %517 = dma.done.wait [#allocation3], 2048  }
  0x20   :  { %518 = vsyncadd [#allocation3], 4294965248 }
  0x21   :  { %38 = sfence }
  0x22   :  { %s401_s27 = sld [smem:[#allocation2 + $0x5]]  ;;  %s40_s28 = sld [smem:[#allocation2]]  ;;  %v41_v0 = vld [vmem:[#allocation6] sm:$0xff]  ;;  %v42_v1 = vld [vmem:[#allocation6 + $0x8] sm:$0xff]  ;;  %v43_v13 = vld [vmem:[#allocation6 + $0x10] sm:$0xff] }
  0x23   :  { %s402_s29 = sld [smem:[#allocation2 + $0x1]]  ;;  %s403_s30 = sld [smem:[#allocation2 + $0x2]]  ;;  %v57_v2 = vld [vmem:[#allocation6 + $0x20] sm:$0xff]  ;;  %v58_v11 = vld [vmem:[#allocation6 + $0x28] sm:$0xff]  ;;  %v59_v17 = vld [vmem:[#allocation6 + $0x30] sm:$0xff] }
  0x24   :  { %s404_s3 = sld [smem:[#allocation2 + $0x3]]  ;;  %s405_s4 = sld [smem:[#allocation2 + $0x4]]  ;;  %v72_v5 = vld [vmem:[#allocation6 + $0x40] sm:$0xff]  ;;  %v73_v12 = vld [vmem:[#allocation6 + $0x48] sm:$0xff]  ;;  %v74_v18 = vld [vmem:[#allocation6 + $0x50] sm:$0xff] }
  0x25   :  { %v87_v6 = vld [vmem:[#allocation6 + $0x60] sm:$0xff]  ;;  %v88_v16 = vld [vmem:[#allocation6 + $0x68] sm:$0xff]  ;;  %v44_v23 = vld [vmem:[#allocation6 + $0x18] sm:$0xff]  ;;  %s525_s1 = smov [#allocation7]  }
  0x26   :  { %v60_v24 = vld [vmem:[#allocation6 + $0x38] sm:$0xff]  ;;  %v89_v29 = vld [vmem:[#allocation6 + $0x70] sm:$0xff]  ;;  %s388_s5 = sshll.u32 %s525_s1, 4  ;;  %s389_s5 = int_to_ptr.vmem [resolvable:$true] %s388_s5 }
  0x27   :  { %v75_v34 = vld [vmem:[#allocation6 + $0x58] sm:$0xff]  ;;  %s493_s6 = scalar_lea.vmem %s389_s5, 4608  ;;  %p498_p0 = scmp.lt.s32.totalorder %s389_s5, %s389_s5 }
  0x28   :  { %v45_v3 = vstv %s40_s28  ;;  %v50_v4 = vstv %s401_s27  ;;  %v90_v42 = vld [vmem:[#allocation6 + $0x78] sm:$0xff]  ;;  %p494_p13 = scmp.ne.s32.totalorder %s389_s5, %s493_s6  ;;  %p499_p1 = scmp.lt.s32.totalorder %s493_s6, %s493_s6 }
  0x29   :  { %v46_v7 = vmul.f32 %v45_v3, %v41_v0  ;;  %v61_v8 = vstv %s402_s29  ;;  %v76_v9 = vstv %s403_s30  ;;  %v47_v10 = vmul.f32 %v45_v3, %v42_v1 }
  0x2a   :  { %v62_v14 = vmul.f32 %v61_v8, %v57_v2  ;;  %v91_v15 = vstv %s404_s3  ;;  %v77_v20 = vmul.f32 %v76_v9, %v72_v5  ;;  %v559_v21 = vstv %s405_s4  ;;  %p500_p2 = por %p499_p1, %p498_p0 }
  0x2b   :  { %v51_v19 = vadd.f32 %v50_v4, %v46_v7  ;;  %v52_v22 = vadd.f32 %v50_v4, %v47_v10  ;;  %v92_v25 = vmul.f32 %v91_v15, %v87_v6  ;;  %v63_v26 = vmul.f32 %v61_v8, %v58_v11 }
  0x2c   :  { %v78_v27 = vmul.f32 %v76_v9, %v73_v12  ;;  %v48_v28 = vmul.f32 %v45_v3, %v43_v13  ;;  %v93_v31 = vmul.f32 %v91_v15, %v88_v16  ;;  %v64_v32 = vmul.f32 %v61_v8, %v59_v17  ;;  %p501_p3 = pnand %p500_p2, %p494_p13 }
  0x2d   :  { %v66_v30 = vadd.f32 %v62_v14, %v51_v19  ;;  %v79_v33 = vmul.f32 %v76_v9, %v74_v18  ;;  %v67_v35 = vadd.f32 %v63_v26, %v52_v22  ;;  %v49_v37 = vmul.f32 %v45_v3, %v44_v23 }
  0x2e   :  { %v53_v36 = vadd.f32 %v50_v4, %v48_v28  ;;  %v65_v38 = vmul.f32 %v61_v8, %v60_v24  ;;  %v102_v40 = vmul.f32 0.0, %v559_v21  ;;  %v94_v41 = vmul.f32 %v91_v15, %v89_v29 }
  0x2f   :  { %v81_v39 = vadd.f32 %v77_v20, %v66_v30  ;;  %v82_v43 = vadd.f32 %v78_v27, %v67_v35  ;;  %v54_v45 = vadd.f32 %v50_v4, %v49_v37  ;;  %v80_v46 = vmul.f32 %v76_v9, %v75_v34 }
  0x30   :  { %v68_v44 = vadd.f32 %v64_v32, %v53_v36  ;;  %v95_v51 = vmul.f32 %v91_v15, %v90_v42 }
  0x31   :  { %v562_v47 = vadd.f32 %v92_v25, %v81_v39  ;;  %v564_v48 = vadd.f32 %v93_v31, %v82_v43  ;;  %v69_v50 = vadd.f32 %v65_v38, %v54_v45 }
  0x32   :  { %v83_v49 = vadd.f32 %v79_v33, %v68_v44 }
  0x33   :  { %v567_v52 = vadd.f32 %v102_v40, %v562_v47  ;;  %v570_v53 = vadd.f32 %v102_v40, %v564_v48  ;;  %v84_v55 = vadd.f32 %v80_v46, %v69_v50 }
  0x34   :  { %v572_v54 = vadd.f32 %v94_v41, %v83_v49 }
  0x35   :  { %v111_v56 = vand.u32 2147483647, %v567_v52  ;;  %167 = vst [vmem:[#allocation7] sm:$0xff] %v567_v52  ;;  %v112_v57 = vand.u32 2147483647, %v570_v53  ;;  %168 = vst [vmem:[#allocation7 + $0x8] sm:$0xff] %v570_v53  ;;  %v581_v59 = vadd.f32 %v95_v51, %v84_v55 }
  0x36   :  { %v579_v58 = vadd.f32 %v102_v40, %v572_v54  ;;  %v107_v25 = vmin.f32 %v567_v52, 0.0  ;;  %v108_v29 = vmin.f32 %v570_v53, 0.0 }
  0x37   :  { %v115_v60 = vsub.f32 0.0, %v111_v56  ;;  %v116_v61 = vsub.f32 0.0, %v112_v57  ;;  %v586_v63 = vadd.f32 %v102_v40, %v581_v59 }
  0x38   :  { %v113_v62 = vand.u32 2147483647, %v579_v58  ;;  %169 = vst [vmem:[#allocation7 + $0x10] sm:$0xff] %v579_v58  ;;  %v109_v39 = vmin.f32 %v579_v58, 0.0 }
  0x39   :  { %v119_v0 = vmul.f32 1.442695, %v115_v60  ;;  %v121_v1 = vmul.f32 1.442695, %v116_v61  ;;  %v114_v3 = vand.u32 2147483647, %v586_v63 }
  0x3a   :  { %v117_v2 = vsub.f32 0.0, %v113_v62  ;;  %170 = vst [vmem:[#allocation7 + $0x18] sm:$0xff] %v586_v63  ;;  %v110_v46 = vmin.f32 %v586_v63, 0.0 }
  0x3b   :  { %411 = vpow2.f32 %v119_v0  ;;  %v118_v5 = vsub.f32 0.0, %v114_v3 }
  0x3c   :  { %413 = vpow2.f32 %v121_v1  ;;  %v123_v4 = vmul.f32 1.442695, %v117_v2 }
  0x3d   :  { %v125_v6 = vmul.f32 1.442695, %v118_v5 }
  0x3e   :  { %415 = vpow2.f32 %v123_v4 }
  0x3f   :  { %417 = vpow2.f32 %v125_v6 }
  0x45   :  { %v412_v7 = vpop.eup %411 }
  0x46   :  { %v414_v8 = vpop.eup %413  ;;  %v127_v9 = vadd.f32 1.0, %v412_v7  ;;  %v130_v12 = vmul.f32 -0.5, %v412_v7  ;;  %v133_v19 = vand.u32 2147483647, %v412_v7 }
  0x47   :  { %v136_v10 = vadd.f32 1.0, %v414_v8  ;;  %v139_v15 = vmul.f32 -0.5, %v414_v8  ;;  %v142_v23 = vand.u32 2147483647, %v414_v8 }
  0x48   :  { %v416_v11 = vpop.eup %415  ;;  %419 = vlog2.f32 %v127_v9  ;;  %v131_v18 = vadd.f32 1.0, %v130_v12  ;;  %vm134_vm0 = vcmp.lt.f32.partialorder %v133_v19, 0.0004427343 }
  0x49   :  { %421 = vlog2.f32 %v136_v10  ;;  %v145_v13 = vadd.f32 1.0, %v416_v11  ;;  %v418_v14 = vpop.eup %417  ;;  %v148_v17 = vmul.f32 -0.5, %v416_v11  ;;  %v140_v20 = vadd.f32 1.0, %v139_v15 }
  0x4a   :  { %v154_v16 = vadd.f32 1.0, %v418_v14  ;;  %v157_v22 = vmul.f32 -0.5, %v418_v14  ;;  %v132_v26 = vmul.f32 %v412_v7, %v131_v18  ;;  %v151_v27 = vand.u32 2147483647, %v416_v11 }
  0x4b   :  { %423 = vlog2.f32 %v145_v13  ;;  %v149_v24 = vadd.f32 1.0, %v148_v17  ;;  %v141_v30 = vmul.f32 %v414_v8, %v140_v20  ;;  %vm143_vm1 = vcmp.lt.f32.partialorder %v142_v23, 0.0004427343 }
  0x4c   :  { %425 = vlog2.f32 %v154_v16  ;;  %v158_v31 = vadd.f32 1.0, %v157_v22  ;;  %v160_v34 = vand.u32 2147483647, %v418_v14  ;;  %vm152_vm2 = vcmp.lt.f32.partialorder %v151_v27, 0.0004427343 }
  0x4d   :  { %v150_v36 = vmul.f32 %v416_v11, %v149_v24 }
  0x4e   :  { %v159_v43 = vmul.f32 %v418_v14, %v158_v31  ;;  %vm161_vm3 = vcmp.lt.f32.partialorder %v160_v34, 0.0004427343 }
  0x52   :  { %v420_v28 = vpop.eup %419 }
  0x53   :  { %v422_v32 = vpop.eup %421  ;;  %v129_v33 = vmul.f32 0.6931472, %v420_v28 }
  0x54   :  { %v138_v35 = vmul.f32 0.6931472, %v422_v32 }
  0x55   :  { %v424_v37 = vpop.eup %423  ;;  %v135_v38 = vsel %vm134_vm0, %v132_v26, %v129_v33 }
  0x56   :  { %v163_v40 = vsub.f32 %v107_v25, %v135_v38  ;;  %v144_v41 = vsel %vm143_vm1, %v141_v30, %v138_v35  ;;  %v147_v42 = vmul.f32 0.6931472, %v424_v37  ;;  %v426_v44 = vpop.eup %425 }
  0x57   :  { %v164_v45 = vsub.f32 %v108_v29, %v144_v41  ;;  %v156_v51 = vmul.f32 0.6931472, %v426_v44 }
  0x58   :  { %176 = vst [vmem:[#allocation7 + $0x60] sm:$0xff] %v163_v40  ;;  %v595_v49 = vsub.f32 %v163_v40, %v567_v52  ;;  %v153_v50 = vsel %vm152_vm2, %v150_v36, %v147_v42 }
  0x59   :  { %177 = vst [vmem:[#allocation7 + $0x68] sm:$0xff] %v164_v45  ;;  %v598_v55 = vsub.f32 %v164_v45, %v570_v53  ;;  %v165_v56 = vsub.f32 %v109_v39, %v153_v50  ;;  %v162_v57 = vsel %vm161_vm3, %v159_v43, %v156_v51 }
  0x5a   :  { %189 = vst [vmem:[#allocation7 + $0xc0] sm:$0xff] %v595_v49  ;;  %v193_v60 = vmul.f32 %v595_v49, %v559_v21  ;;  %v166_v52 = vsub.f32 %v110_v46, %v162_v57 }
  0x5b   :  { %190 = vst [vmem:[#allocation7 + $0xc8] sm:$0xff] %v598_v55  ;;  %178 = vst [vmem:[#allocation7 + $0x70] sm:$0xff] %v165_v56  ;;  %v605_v61 = vsub.f32 %v165_v56, %v579_v58  ;;  %v194_v62 = vmul.f32 %v598_v55, %v559_v21 }
  0x5c   :  { %v610_v53 = vadd.f32 %v193_v60, %v562_v47  ;;  %179 = vst [vmem:[#allocation7 + $0x78] sm:$0xff] %v166_v52  ;;  %v614_v0 = vsub.f32 %v166_v52, %v586_v63 }
  0x5d   :  { %191 = vst [vmem:[#allocation7 + $0xd0] sm:$0xff] %v605_v61  ;;  %v617_v1 = vadd.f32 %v194_v62, %v564_v48  ;;  %v195_v58 = vmul.f32 %v605_v61, %v559_v21 }
  0x5e   :  { %v205_v2 = vand.u32 2147483647, %v610_v53  ;;  %262 = vst [vmem:[#allocation7 + $0x20] sm:$0xff] %v610_v53  ;;  %192 = vst [vmem:[#allocation7 + $0xd8] sm:$0xff] %v614_v0  ;;  %v196_v63 = vmul.f32 %v614_v0, %v559_v21  ;;  %v201_v34 = vmin.f32 %v610_v53, 0.0 }
  0x5f   :  { %v206_v3 = vand.u32 2147483647, %v617_v1  ;;  %263 = vst [vmem:[#allocation7 + $0x28] sm:$0xff] %v617_v1  ;;  %v627_v4 = vadd.f32 %v195_v58, %v572_v54  ;;  %v202_v38 = vmin.f32 %v617_v1, 0.0 }
  0x60   :  { %v209_v5 = vsub.f32 0.0, %v205_v2  ;;  %v634_v8 = vadd.f32 %v196_v63, %v581_v59 }
  0x61   :  { %v210_v6 = vsub.f32 0.0, %v206_v3  ;;  %v207_v7 = vand.u32 2147483647, %v627_v4  ;;  %264 = vst [vmem:[#allocation7 + $0x30] sm:$0xff] %v627_v4  ;;  %v203_v51 = vmin.f32 %v627_v4, 0.0 }
  0x62   :  { %v213_v9 = vmul.f32 1.442695, %v209_v5  ;;  %v208_v12 = vand.u32 2147483647, %v634_v8  ;;  %265 = vst [vmem:[#allocation7 + $0x38] sm:$0xff] %v634_v8  ;;  %v204_v2 = vmin.f32 %v634_v8, 0.0 }
  0x63   :  { %v215_v10 = vmul.f32 1.442695, %v210_v6  ;;  %v211_v11 = vsub.f32 0.0, %v207_v7 }
  0x64   :  { %427 = vpow2.f32 %v213_v9  ;;  %v212_v14 = vsub.f32 0.0, %v208_v12 }
  0x65   :  { %429 = vpow2.f32 %v215_v10  ;;  %v217_v13 = vmul.f32 1.442695, %v211_v11 }
  0x66   :  { %v219_v15 = vmul.f32 1.442695, %v212_v14 }
  0x67   :  { %431 = vpow2.f32 %v217_v13 }
  0x68   :  { %433 = vpow2.f32 %v219_v15 }
  0x6e   :  { %v428_v16 = vpop.eup %427 }
  0x6f   :  { %v430_v17 = vpop.eup %429  ;;  %v221_v18 = vadd.f32 1.0, %v428_v16  ;;  %v224_v22 = vmul.f32 -0.5, %v428_v16  ;;  %v227_v29 = vand.u32 2147483647, %v428_v16 }
  0x70   :  { %v230_v19 = vadd.f32 1.0, %v430_v17  ;;  %v233_v25 = vmul.f32 -0.5, %v430_v17  ;;  %v236_v32 = vand.u32 2147483647, %v430_v17 }
  0x71   :  { %v432_v20 = vpop.eup %431  ;;  %435 = vlog2.f32 %v221_v18  ;;  %v225_v28 = vadd.f32 1.0, %v224_v22  ;;  %vm228_vm4 = vcmp.lt.f32.partialorder %v227_v29, 0.0004427343 }
  0x72   :  { %437 = vlog2.f32 %v230_v19  ;;  %v239_v23 = vadd.f32 1.0, %v432_v20  ;;  %v434_v24 = vpop.eup %433  ;;  %v242_v27 = vmul.f32 -0.5, %v432_v20  ;;  %v234_v30 = vadd.f32 1.0, %v233_v25 }
  0x73   :  { %v248_v26 = vadd.f32 1.0, %v434_v24  ;;  %v251_v31 = vmul.f32 -0.5, %v434_v24  ;;  %v226_v35 = vmul.f32 %v428_v16, %v225_v28  ;;  %v245_v36 = vand.u32 2147483647, %v432_v20 }
  0x74   :  { %439 = vlog2.f32 %v239_v23  ;;  %v243_v33 = vadd.f32 1.0, %v242_v27  ;;  %v235_v39 = vmul.f32 %v430_v17, %v234_v30  ;;  %vm237_vm5 = vcmp.lt.f32.partialorder %v236_v32, 0.0004427343 }
  0x75   :  { %441 = vlog2.f32 %v248_v26  ;;  %v252_v40 = vadd.f32 1.0, %v251_v31  ;;  %v254_v43 = vand.u32 2147483647, %v434_v24  ;;  %vm246_vm6 = vcmp.lt.f32.partialorder %v245_v36, 0.0004427343 }
  0x76   :  { %v244_v45 = vmul.f32 %v432_v20, %v243_v33 }
  0x77   :  { %v253_v52 = vmul.f32 %v434_v24, %v252_v40  ;;  %vm255_vm7 = vcmp.lt.f32.partialorder %v254_v43, 0.0004427343 }
  0x7b   :  { %v436_v37 = vpop.eup %435 }
  0x7c   :  { %v438_v41 = vpop.eup %437  ;;  %v223_v42 = vmul.f32 0.6931472, %v436_v37 }
  0x7d   :  { %v232_v44 = vmul.f32 0.6931472, %v438_v41 }
  0x7e   :  { %v440_v46 = vpop.eup %439  ;;  %v229_v50 = vsel %vm228_vm4, %v226_v35, %v223_v42 }
  0x7f   :  { %v257_v56 = vsub.f32 %v201_v34, %v229_v50  ;;  %v238_v57 = vsel %vm237_vm5, %v235_v39, %v232_v44  ;;  %v241_v60 = vmul.f32 0.6931472, %v440_v46  ;;  %v442_v62 = vpop.eup %441 }
  0x80   :  { %v258_v58 = vsub.f32 %v202_v38, %v238_v57  ;;  %v250_v6 = vmul.f32 0.6931472, %v442_v62 }
  0x81   :  { %v266_v3 = vadd.f32 %v257_v56, %v595_v49  ;;  %v275_v63 = vsub.f32 %v257_v56, %v610_v53  ;;  %v247_v5 = vsel %vm246_vm6, %v244_v45, %v241_v60 }
  0x82   :  { %v267_v7 = vadd.f32 %v258_v58, %v598_v55  ;;  %v276_v9 = vsub.f32 %v258_v58, %v617_v1  ;;  %v259_v10 = vsub.f32 %v203_v51, %v247_v5  ;;  %v256_v12 = vsel %vm255_vm7, %v253_v52, %v250_v6 }
  0x83   :  { %271 = vst [vmem:[#allocation7 + $0x80] sm:$0xff] %v266_v3  ;;  %v647_v11 = vadd.f32 %v275_v63, %v595_v49  ;;  %v260_v15 = vsub.f32 %v204_v2, %v256_v12 }
  0x84   :  { %272 = vst [vmem:[#allocation7 + $0x88] sm:$0xff] %v267_v7  ;;  %v650_v13 = vadd.f32 %v276_v9, %v598_v55  ;;  %v268_v14 = vadd.f32 %v259_v10, %v605_v61  ;;  %v277_v53 = vsub.f32 %v259_v10, %v627_v4 }
  0x85   :  { %284 = vst [vmem:[#allocation7 + $0xe0] sm:$0xff] %v647_v11  ;;  %v288_v1 = vmul.f32 %v647_v11, %v559_v21  ;;  %v269_v16 = vadd.f32 %v260_v15, %v614_v0  ;;  %v278_v55 = vsub.f32 %v260_v15, %v634_v8 }
  0x86   :  { %285 = vst [vmem:[#allocation7 + $0xe8] sm:$0xff] %v650_v13  ;;  %273 = vst [vmem:[#allocation7 + $0x90] sm:$0xff] %v268_v14  ;;  %v659_v49 = vadd.f32 %v277_v53, %v605_v61  ;;  %v289_v17 = vmul.f32 %v650_v13, %v559_v21 }
  0x87   :  { %v666_v4 = vadd.f32 %v288_v1, %v562_v47  ;;  %274 = vst [vmem:[#allocation7 + $0x98] sm:$0xff] %v269_v16  ;;  %v670_v18 = vadd.f32 %v278_v55, %v614_v0 }
  0x88   :  { %286 = vst [vmem:[#allocation7 + $0xf0] sm:$0xff] %v659_v49  ;;  %v673_v19 = vadd.f32 %v289_v17, %v564_v48  ;;  %v290_v61 = vmul.f32 %v659_v49, %v559_v21 }
  0x89   :  { %v300_v8 = vand.u32 2147483647, %v666_v4  ;;  %357 = vst [vmem:[#allocation7 + $0x40] sm:$0xff] %v666_v4  ;;  %287 = vst [vmem:[#allocation7 + $0xf8] sm:$0xff] %v670_v18  ;;  %v291_v48 = vmul.f32 %v670_v18, %v559_v21  ;;  %v296_v46 = vmin.f32 %v666_v4, 0.0 }
  0x8a   :  { %v301_v47 = vand.u32 2147483647, %v673_v19  ;;  %358 = vst [vmem:[#allocation7 + $0x48] sm:$0xff] %v673_v19  ;;  %v683_v20 = vadd.f32 %v290_v61, %v572_v54  ;;  %v297_v57 = vmin.f32 %v673_v19, 0.0 }
  0x8b   :  { %v304_v0 = vsub.f32 0.0, %v300_v8  ;;  %v690_v24 = vadd.f32 %v291_v48, %v581_v59 }
  0x8c   :  { %v305_v22 = vsub.f32 0.0, %v301_v47  ;;  %v302_v23 = vand.u32 2147483647, %v683_v20  ;;  %359 = vst [vmem:[#allocation7 + $0x50] sm:$0xff] %v683_v20  ;;  %v298_v7 = vmin.f32 %v683_v20, 0.0 }
  0x8d   :  { %v308_v25 = vmul.f32 1.442695, %v304_v0  ;;  %v303_v28 = vand.u32 2147483647, %v690_v24  ;;  %360 = vst [vmem:[#allocation7 + $0x58] sm:$0xff] %v690_v24  ;;  %v299_v1 = vmin.f32 %v690_v24, 0.0 }
  0x8e   :  { %v310_v26 = vmul.f32 1.442695, %v305_v22  ;;  %v306_v27 = vsub.f32 0.0, %v302_v23 }
  0x8f   :  { %443 = vpow2.f32 %v308_v25  ;;  %v307_v21 = vsub.f32 0.0, %v303_v28 }
  0x90   :  { %445 = vpow2.f32 %v310_v26  ;;  %v312_v54 = vmul.f32 1.442695, %v306_v27 }
  0x91   :  { %v314_v29 = vmul.f32 1.442695, %v307_v21 }
  0x92   :  { %447 = vpow2.f32 %v312_v54 }
  0x93   :  { %449 = vpow2.f32 %v314_v29 }
  0x99   :  { %v444_v30 = vpop.eup %443 }
  0x9a   :  { %v446_v31 = vpop.eup %445  ;;  %v316_v32 = vadd.f32 1.0, %v444_v30  ;;  %v319_v34 = vmul.f32 -0.5, %v444_v30  ;;  %v322_v41 = vand.u32 2147483647, %v444_v30 }
  0x9b   :  { %v325_v33 = vadd.f32 1.0, %v446_v31  ;;  %v328_v37 = vmul.f32 -0.5, %v446_v31  ;;  %v331_v44 = vand.u32 2147483647, %v446_v31 }
  0x9c   :  { %v448_v59 = vpop.eup %447  ;;  %451 = vlog2.f32 %v316_v32  ;;  %v320_v40 = vadd.f32 1.0, %v319_v34  ;;  %vm323_vm8 = vcmp.lt.f32.partialorder %v322_v41, 0.0004427343 }
  0x9d   :  { %453 = vlog2.f32 %v325_v33  ;;  %v334_v35 = vadd.f32 1.0, %v448_v59  ;;  %v450_v36 = vpop.eup %449  ;;  %v337_v39 = vmul.f32 -0.5, %v448_v59  ;;  %v329_v42 = vadd.f32 1.0, %v328_v37 }
  0x9e   :  { %v343_v38 = vadd.f32 1.0, %v450_v36  ;;  %v346_v43 = vmul.f32 -0.5, %v450_v36  ;;  %v321_v50 = vmul.f32 %v444_v30, %v320_v40  ;;  %v340_v51 = vand.u32 2147483647, %v448_v59 }
  0x9f   :  { %455 = vlog2.f32 %v334_v35  ;;  %v338_v45 = vadd.f32 1.0, %v337_v39  ;;  %v330_v60 = vmul.f32 %v446_v31, %v329_v42  ;;  %vm332_vm9 = vcmp.lt.f32.partialorder %v331_v44, 0.0004427343 }
  0xa0   :  { %457 = vlog2.f32 %v343_v38  ;;  %v347_v52 = vadd.f32 1.0, %v346_v43  ;;  %v349_v2 = vand.u32 2147483647, %v450_v36  ;;  %vm341_vm10 = vcmp.lt.f32.partialorder %v340_v51, 0.0004427343 }
  0xa1   :  { %v339_v63 = vmul.f32 %v448_v59, %v338_v45 }
  0xa2   :  { %v348_v14 = vmul.f32 %v450_v36, %v347_v52  ;;  %vm350_vm11 = vcmp.lt.f32.partialorder %v349_v2, 0.0004427343 }
  0xa6   :  { %v452_v56 = vpop.eup %451 }
  0xa7   :  { %v454_v62 = vpop.eup %453  ;;  %v318_v58 = vmul.f32 0.6931472, %v452_v56 }
  0xa8   :  { %v327_v3 = vmul.f32 0.6931472, %v454_v62 }
  0xa9   :  { %v456_v5 = vpop.eup %455  ;;  %v324_v6 = vsel %vm323_vm8, %v321_v50, %v318_v58 }
  0xaa   :  { %v352_v9 = vsub.f32 %v296_v46, %v324_v6  ;;  %v333_v10 = vsel %vm332_vm9, %v330_v60, %v327_v3  ;;  %v336_v12 = vmul.f32 0.6931472, %v456_v5  ;;  %v458_v53 = vpop.eup %457 }
  0xab   :  { %v353_v15 = vsub.f32 %v297_v57, %v333_v10  ;;  %v345_v17 = vmul.f32 0.6931472, %v458_v53 }
  0xac   :  { %v361_v16 = vadd.f32 %v352_v9, %v647_v11  ;;  %v342_v55 = vsel %vm341_vm10, %v339_v63, %v336_v12  ;;  %v370_v61 = vsub.f32 %v352_v9, %v666_v4 }
  0xad   :  { %v362_v8 = vadd.f32 %v353_v15, %v650_v13  ;;  %v354_v47 = vsub.f32 %v298_v7, %v342_v55  ;;  %v371_v48 = vsub.f32 %v353_v15, %v673_v19  ;;  %v351_v0 = vsel %vm350_vm11, %v348_v14, %v345_v17 }
  0xae   :  { %366 = vst [vmem:[#allocation7 + $0xa0] sm:$0xff] %v361_v16  ;;  %v374_v22 = vadd.f32 %v370_v61, %v647_v11  ;;  %v355_v25 = vsub.f32 %v299_v1, %v351_v0 }
  0xaf   :  { %367 = vst [vmem:[#allocation7 + $0xa8] sm:$0xff] %v362_v8  ;;  %v363_v23 = vadd.f32 %v354_v47, %v659_v49  ;;  %v375_v26 = vadd.f32 %v371_v48, %v650_v13  ;;  %v372_v27 = vsub.f32 %v354_v47, %v683_v20 }
  0xb0   :  { %379 = vst [vmem:[#allocation7 + $0x100] sm:$0xff] %v374_v22  ;;  %v364_v4 = vadd.f32 %v355_v25, %v670_v18  ;;  %v373_v28 = vsub.f32 %v355_v25, %v690_v24 }
  0xb1   :  { %368 = vst [vmem:[#allocation7 + $0xb0] sm:$0xff] %v363_v23  ;;  %380 = vst [vmem:[#allocation7 + $0x108] sm:$0xff] %v375_v26  ;;  %v376_v19 = vadd.f32 %v372_v27, %v659_v49 }
  0xb2   :  { %369 = vst [vmem:[#allocation7 + $0xb8] sm:$0xff] %v364_v4  ;;  %v377_v11 = vadd.f32 %v373_v28, %v670_v18 }
  0xb3   :  { %381 = vst [vmem:[#allocation7 + $0x110] sm:$0xff] %v376_v19 }
  0xb4   :  { %382 = vst [vmem:[#allocation7 + $0x118] sm:$0xff] %v377_v11 }
  0xb5   :  { %504 = shalt.err (!%p501_p3)
}
  0xb6   :  { %s505_s9 = scalar_lea.hbm %s727_s2, 4608 }
  0xb7   :  { %p506_p4 = scmp.ne.s32.totalorder %s727_s2, %s505_s9  ;;  %p509_p5 = scmp.lt.u32.totalorder %s505_s9, %s727_s2 }
  0xb9   :  { %p511_p6 = pnand %p509_p5, %p506_p4 }
  0xbb   :  { %514 = shalt.err (!%p511_p6)
}
  0xbc   :  { %394 = dma.vmem_to_hbm [thread:$0]  %s389_s5, 4608, %s727_s2, [#allocation4], %s523_s23, %s523_s23, %s524_s24  }
  0xbd   :  { %519 = dma.done.wait [#allocation4], 4608  }
  0xbe   :  { %520 = vsyncadd [#allocation4], 4294962688 }
  0xbf   :  { %398 = vsyncpa [#allocation3], 1 }
  0xc0   :  { %399 = vsyncpa [#allocation4], 1 }
  0xc1   :  { %400 = vsyncpa [#allocation5], 1 }

</bundles_post_ra>
